<compile_context>
chip_gen: v7x
topology: tpu7x:2x2x1
jax: 0.10.0
libtpu: 0.0.40
codegen_flags: <defaults>
</compile_context>

<pallas_src>
import jax
import jax.numpy as jnp
from jax.experimental import pallas as pl
from jax.experimental.pallas import tpu as pltpu


def _critic_kernel(s_ref, a_ref, w1s_ref, w1a_ref, b1_ref, w2_ref, b2_ref,
                   w3_ref, b3_ref, o_ref):
    # fc1 with the concat fused: x @ W1 == state @ W1[:S] + action @ W1[S:]
    h1 = jnp.dot(s_ref[...], w1s_ref[...], preferred_element_type=jnp.float32)
    h1 = h1 + jnp.dot(a_ref[...], w1a_ref[...],
                      preferred_element_type=jnp.float32)
    h1 = jnp.maximum(h1 + b1_ref[...], 0.0)          # bias + ReLU (VPU)

    # fc2
    h2 = jnp.dot(h1, w2_ref[...], preferred_element_type=jnp.float32)
    h2 = jnp.maximum(h2 + b2_ref[...], 0.0)

    # fc3: [1, H2] x [H2, TB] -> [1, TB]. Produces the lane-dense output row
    # directly (unmasked stores) and avoids a degenerate N=1 MXU matmul.
    q = jnp.dot(w3_ref[...], h2.T, preferred_element_type=jnp.float32)
    o_ref[...] = (q + b3_ref[...]).astype(o_ref.dtype)


def critic_forward(state, action, params, *, block_b=512):
    """Pallas forward pass. state: [B, S], action: [B, A] -> q: [B, 1]."""
    w1, b1, w2, b2, w3, b3 = params
    B, S = state.shape
    A = action.shape[1]
    H1 = w1.shape[1]
    H2 = w2.shape[1]

    # Static slices (free) so the concat is fused into two in-kernel dots.
    w1_s = w1[:S]                     # [S, H1]
    w1_a = w1[S:]                     # [A, H1]
    w3_row = w3.reshape(1, H2)        # fc3 weight as a lane-dense row

    # Batch tiling: one whole-batch block for small B (block == full array, so
    # no (8,128) divisibility constraint); otherwise tiles of `block_b` rows
    # (multiple of 128 -> lane-dense output tiles, sublane-aligned inputs).
    if B <= block_b:
        tb = B
        b_pad = B
    else:
        tb = block_b
        b_pad = pl.cdiv(B, tb) * tb
    if b_pad != B:
        pad = b_pad - B
        state = jnp.pad(state, ((0, pad), (0, 0)))
        action = jnp.pad(action, ((0, pad), (0, 0)))
    grid = (b_pad // tb,)

    # Weights/biases: same block index at every grid step -> VMEM-resident.
    resident = lambda shape: pl.BlockSpec(shape, lambda i: (0, 0))

    flops = 2 * b_pad * ((S + A) * H1 + H1 * H2 + H2)
    bytes_accessed = 4 * (b_pad * (S + A + 1)
                          + (S + A) * H1 + H1 + H1 * H2 + H2 + H2 + 1)

    out = pl.pallas_call(
        _critic_kernel,
        out_shape=jax.ShapeDtypeStruct((1, b_pad), jnp.float32),
        grid=grid,
        in_specs=[
            pl.BlockSpec((tb, S), lambda i: (i, 0)),   # state tile
            pl.BlockSpec((tb, A), lambda i: (i, 0)),   # action tile
            resident((S, H1)),                         # W1[:S]
            resident((A, H1)),                         # W1[S:]
            resident((1, H1)),                         # b1
            resident((H1, H2)),                        # W2
            resident((1, H2)),                         # b2
            resident((1, H2)),                         # W3 as [1, H2] row
            resident((1, 1)),                          # b3
        ],
        out_specs=pl.BlockSpec((1, tb), lambda i: (0, i)),   # lane-dense q row
        compiler_params=pltpu.CompilerParams(
            dimension_semantics=("parallel",)),
        cost_estimate=pl.CostEstimate(
            flops=flops, transcendentals=0, bytes_accessed=bytes_accessed),
    )(state, action, w1_s, w1_a, b1, w2, b2, w3_row, b3)

    return out[0, :B].reshape(B, 1)


def init_critic_params(key, state_dim, action_dim, hidden1, hidden2):
    """Deterministic synthetic parameters (shapes match nn.Linear in __init__)."""
    d_in = state_dim + action_dim
    k1, k2, k3, k4, k5, k6 = jax.random.split(key, 6)
    w1 = jax.random.normal(k1, (d_in, hidden1), jnp.float32) * 0.1
    b1 = jax.random.normal(k2, (1, hidden1), jnp.float32) * 0.1
    w2 = jax.random.normal(k3, (hidden1, hidden2), jnp.float32) * 0.1
    b2 = jax.random.normal(k4, (1, hidden2), jnp.float32) * 0.1
    w3 = jax.random.normal(k5, (hidden2, 1), jnp.float32) * 0.1
    b3 = jax.random.normal(k6, (1, 1), jnp.float32) * 0.1
    return (w1, b1, w2, b2, w3, b3)


def critic_reference(state, action, params):
    """Pure-JAX reference mirroring the PyTorch forward."""
    w1, b1, w2, b2, w3, b3 = params
    x = jnp.concatenate([state, action], axis=1)
    x = jnp.maximum(x @ w1 + b1, 0.0)
    x = jnp.maximum(x @ w2 + b2, 0.0)
    return x @ w3 + b3


if __name__ == "__main__":
    # Small shapes consistent with the module: batch=2, state_dim=8,
    # action_dim=4, hidden_size1=32, hidden_size2=32.
    B, S, A, H1, H2 = 2, 8, 4, 32, 32

    key = jax.random.PRNGKey(0)
    ks, ka, kp = jax.random.split(key, 3)
    state = jax.random.normal(ks, (B, S), jnp.float32)
    action = jax.random.normal(ka, (B, A), jnp.float32)
    params = init_critic_params(kp, S, A, H1, H2)

    q = critic_forward(state, action, params)
    jax.block_until_ready(q)
    q_ref = critic_reference(state, action, params)
    assert q.shape == (B, 1), q.shape
    assert jnp.allclose(q, q_ref, atol=1e-5, rtol=1e-5), (q, q_ref)

    # Larger batch: exercises the batch grid (TB=512), padding, and the
    # lane-dense tiled output path.
    B2 = 1280
    ks2, ka2 = jax.random.split(jax.random.PRNGKey(1))
    state2 = jax.random.normal(ks2, (B2, S), jnp.float32)
    action2 = jax.random.normal(ka2, (B2, A), jnp.float32)
    q2 = critic_forward(state2, action2, params)
    jax.block_until_ready(q2)
    q2_ref = critic_reference(state2, action2, params)
    assert q2.shape == (B2, 1), q2.shape
    assert jnp.allclose(q2, q2_ref, atol=1e-4, rtol=1e-4)

    print("KERNEL_OK")
</pallas_src>

<mosaic_0001>
module attributes {stable_mosaic.version = 11 : i64} {
  func.func @_critic_kernel(%arg0: i32, %arg1: memref<2x8xf32, #tpu.memory_space<vmem>>, %arg2: memref<2x4xf32, #tpu.memory_space<vmem>>, %arg3: memref<8x32xf32, #tpu.memory_space<vmem>>, %arg4: memref<4x32xf32, #tpu.memory_space<vmem>>, %arg5: memref<1x32xf32, #tpu.memory_space<vmem>>, %arg6: memref<32x32xf32, #tpu.memory_space<vmem>>, %arg7: memref<1x32xf32, #tpu.memory_space<vmem>>, %arg8: memref<1x32xf32, #tpu.memory_space<vmem>>, %arg9: memref<1x1xf32, #tpu.memory_space<vmem>>, %arg10: memref<1x2xf32, #tpu.memory_space<vmem>>) attributes {dimension_semantics = [#tpu.dimension_semantics<parallel>], iteration_bounds = array<i64: 1>, scalar_prefetch = 0 : i64, scratch_operands = 0 : i64, tpu.core_type = #tpu.core_type<tc>, window_params = [{transform_indices = @transform_0, window_bounds = array<i64: 2, 8>}, {transform_indices = @transform_1, window_bounds = array<i64: 2, 4>}, {pipeline_mode = #tpu.pipeline_mode<synchronous>, transform_indices = @transform_2, window_bounds = array<i64: 8, 32>}, {pipeline_mode = #tpu.pipeline_mode<synchronous>, transform_indices = @transform_3, window_bounds = array<i64: 4, 32>}, {pipeline_mode = #tpu.pipeline_mode<synchronous>, transform_indices = @transform_4, window_bounds = array<i64: 1, 32>}, {pipeline_mode = #tpu.pipeline_mode<synchronous>, transform_indices = @transform_5, window_bounds = array<i64: 32, 32>}, {pipeline_mode = #tpu.pipeline_mode<synchronous>, transform_indices = @transform_6, window_bounds = array<i64: 1, 32>}, {pipeline_mode = #tpu.pipeline_mode<synchronous>, transform_indices = @transform_7, window_bounds = array<i64: 1, 32>}, {pipeline_mode = #tpu.pipeline_mode<synchronous>, transform_indices = @transform_8, window_bounds = array<i64: 1, 1>}, {transform_indices = @transform_9, window_bounds = array<i64: 1, 2>}]} {
    %c0 = arith.constant 0 : index
    %c0_0 = arith.constant 0 : index
    %0 = vector.load %arg1[%c0, %c0_0] : memref<2x8xf32, #tpu.memory_space<vmem>>, vector<2x8xf32>
    %c0_1 = arith.constant 0 : index
    %c0_2 = arith.constant 0 : index
    %1 = vector.load %arg3[%c0_1, %c0_2] : memref<8x32xf32, #tpu.memory_space<vmem>>, vector<8x32xf32>
    %cst = arith.constant dense<0.000000e+00> : vector<2x32xf32>
    %2 = tpu.matmul %0, %1, %cst {dimension_numbers = #tpu.dot_dimension_numbers<[1], [0], [0], [1], [0, 0, 1, 1], [], []>} : vector<2x8xf32>, vector<8x32xf32>, vector<2x32xf32> -> vector<2x32xf32>
    %c0_3 = arith.constant 0 : index
    %c0_4 = arith.constant 0 : index
    %3 = vector.load %arg2[%c0_3, %c0_4] : memref<2x4xf32, #tpu.memory_space<vmem>>, vector<2x4xf32>
    %c0_5 = arith.constant 0 : index
    %c0_6 = arith.constant 0 : index
    %4 = vector.load %arg4[%c0_5, %c0_6] : memref<4x32xf32, #tpu.memory_space<vmem>>, vector<4x32xf32>
    %cst_7 = arith.constant dense<0.000000e+00> : vector<2x32xf32>
    %5 = tpu.matmul %3, %4, %cst_7 {dimension_numbers = #tpu.dot_dimension_numbers<[1], [0], [0], [1], [0, 0, 1, 1], [], []>} : vector<2x4xf32>, vector<4x32xf32>, vector<2x32xf32> -> vector<2x32xf32>
    %6 = arith.addf %2, %5 : vector<2x32xf32>
    %c0_8 = arith.constant 0 : index
    %c0_9 = arith.constant 0 : index
    %7 = vector.load %arg5[%c0_8, %c0_9] : memref<1x32xf32, #tpu.memory_space<vmem>>, vector<1x32xf32>
    %8 = vector.broadcast %7 : vector<1x32xf32> to vector<2x32xf32>
    %9 = arith.addf %6, %8 : vector<2x32xf32>
    %cst_10 = arith.constant 0.000000e+00 : f32
    %10 = vector.broadcast %cst_10 : f32 to vector<2x32xf32>
    %11 = arith.maximumf %9, %10 : vector<2x32xf32>
    %c0_11 = arith.constant 0 : index
    %c0_12 = arith.constant 0 : index
    %12 = vector.load %arg6[%c0_11, %c0_12] : memref<32x32xf32, #tpu.memory_space<vmem>>, vector<32x32xf32>
    %cst_13 = arith.constant dense<0.000000e+00> : vector<2x32xf32>
    %13 = tpu.matmul %11, %12, %cst_13 {dimension_numbers = #tpu.dot_dimension_numbers<[1], [0], [0], [1], [0, 0, 1, 1], [], []>} : vector<2x32xf32>, vector<32x32xf32>, vector<2x32xf32> -> vector<2x32xf32>
    %c0_14 = arith.constant 0 : index
    %c0_15 = arith.constant 0 : index
    %14 = vector.load %arg7[%c0_14, %c0_15] : memref<1x32xf32, #tpu.memory_space<vmem>>, vector<1x32xf32>
    %15 = vector.broadcast %14 : vector<1x32xf32> to vector<2x32xf32>
    %16 = arith.addf %13, %15 : vector<2x32xf32>
    %cst_16 = arith.constant 0.000000e+00 : f32
    %17 = vector.broadcast %cst_16 : f32 to vector<2x32xf32>
    %18 = arith.maximumf %16, %17 : vector<2x32xf32>
    %c0_17 = arith.constant 0 : index
    %c0_18 = arith.constant 0 : index
    %19 = vector.load %arg8[%c0_17, %c0_18] : memref<1x32xf32, #tpu.memory_space<vmem>>, vector<1x32xf32>
    %20 = tpu.transpose %18, [1, 0] : vector<2x32xf32> -> vector<32x2xf32>
    %cst_19 = arith.constant dense<0.000000e+00> : vector<1x2xf32>
    %21 = tpu.matmul %19, %20, %cst_19 {dimension_numbers = #tpu.dot_dimension_numbers<[1], [0], [0], [1], [0, 0, 1, 1], [], []>} : vector<1x32xf32>, vector<32x2xf32>, vector<1x2xf32> -> vector<1x2xf32>
    %c0_20 = arith.constant 0 : index
    %c0_21 = arith.constant 0 : index
    %22 = vector.load %arg9[%c0_20, %c0_21] : memref<1x1xf32, #tpu.memory_space<vmem>>, vector<1x1xf32>
    %23 = vector.broadcast %22 : vector<1x1xf32> to vector<1x2xf32>
    %24 = arith.addf %21, %23 : vector<1x2xf32>
    %c0_22 = arith.constant 0 : index
    %c0_23 = arith.constant 0 : index
    %25 = vector.load %arg10[%c0_22, %c0_23] : memref<1x2xf32, #tpu.memory_space<vmem>>, vector<1x2xf32>
    tpu.vector_store %arg10[%c0_22, %c0_23], %24 {strides = array<i32>} : memref<1x2xf32, #tpu.memory_space<vmem>>, vector<1x2xf32>,
    return
  }
  func.func @transform_0(%arg0: i32) -> (i32, i32) {
    %c0_i32 = arith.constant 0 : i32
    %c0_i32_0 = arith.constant 0 : i32
    return %arg0, %c0_i32 : i32, i32
  }
  func.func @transform_1(%arg0: i32) -> (i32, i32) {
    %c0_i32 = arith.constant 0 : i32
    %c0_i32_0 = arith.constant 0 : i32
    return %arg0, %c0_i32 : i32, i32
  }
  func.func @transform_2(%arg0: i32) -> (i32, i32) {
    %c0_i32 = arith.constant 0 : i32
    %c0_i32_0 = arith.constant 0 : i32
    %c0_i32_1 = arith.constant 0 : i32
    return %c0_i32, %c0_i32_0 : i32, i32
  }
  func.func @transform_3(%arg0: i32) -> (i32, i32) {
    %c0_i32 = arith.constant 0 : i32
    %c0_i32_0 = arith.constant 0 : i32
    %c0_i32_1 = arith.constant 0 : i32
    return %c0_i32, %c0_i32_0 : i32, i32
  }
  func.func @transform_4(%arg0: i32) -> (i32, i32) {
    %c0_i32 = arith.constant 0 : i32
    %c0_i32_0 = arith.constant 0 : i32
    %c0_i32_1 = arith.constant 0 : i32
    return %c0_i32, %c0_i32_0 : i32, i32
  }
  func.func @transform_5(%arg0: i32) -> (i32, i32) {
    %c0_i32 = arith.constant 0 : i32
    %c0_i32_0 = arith.constant 0 : i32
    %c0_i32_1 = arith.constant 0 : i32
    return %c0_i32, %c0_i32_0 : i32, i32
  }
  func.func @transform_6(%arg0: i32) -> (i32, i32) {
    %c0_i32 = arith.constant 0 : i32
    %c0_i32_0 = arith.constant 0 : i32
    %c0_i32_1 = arith.constant 0 : i32
    return %c0_i32, %c0_i32_0 : i32, i32
  }
  func.func @transform_7(%arg0: i32) -> (i32, i32) {
    %c0_i32 = arith.constant 0 : i32
    %c0_i32_0 = arith.constant 0 : i32
    %c0_i32_1 = arith.constant 0 : i32
    return %c0_i32, %c0_i32_0 : i32, i32
  }
  func.func @transform_8(%arg0: i32) -> (i32, i32) {
    %c0_i32 = arith.constant 0 : i32
    %c0_i32_0 = arith.constant 0 : i32
    %c0_i32_1 = arith.constant 0 : i32
    return %c0_i32, %c0_i32_0 : i32, i32
  }
  func.func @transform_9(%arg0: i32) -> (i32, i32) {
    %c0_i32 = arith.constant 0 : i32
    %c0_i32_0 = arith.constant 0 : i32
    return %c0_i32, %arg0 : i32, i32
  }
}

</mosaic_0001>

<bundles_post_ra>
// kernel: tpu_custom_call.1
= control target key start
LH: loop header
LB: loop body
LE: loop exit
PB: predicated region body
PF: predicated region fallthrough
CT: control target
= control target key end

     0   :  { %s677_s0 = inlined_call_operand.vmem [shape: f32[2,8], index: 0, kind: input, shape index: {}]   ;;  %s678_s1 = inlined_call_operand.hbm [shape: f32[2,4], index: 1, kind: input, shape index: {}]   ;;  %s679_s2 = inlined_call_operand.vmem [shape: f32[8,32], index: 2, kind: input, shape index: {}]   ;;  %s680_s3 = inlined_call_operand.vmem [shape: f32[4,32], index: 3, kind: input, shape index: {}]   ;;  %s681_s4 = inlined_call_operand.vmem [shape: f32[1,32], index: 4, kind: input, shape index: {}]   ;;  %s682_s5 = inlined_call_operand.hbm [shape: f32[32,32], index: 5, kind: input, shape index: {}]   ;;  %s683_s6 = inlined_call_operand.vmem [shape: f32[1,32], index: 6, kind: input, shape index: {}]   ;;  %s684_s7 = inlined_call_operand.vmem [shape: f32[1,32], index: 7, kind: input, shape index: {}]   ;;  %s685_s8 = inlined_call_operand.<no memory space> [shape: f32[1,1], index: 8, kind: input, shape index: {}]   ;;  %s686_s9 = inlined_call_operand.hbm [shape: f32[1,2], index: 9, kind: output, shape index: {}]  }
   0x1   :  { %v14_v0 = vstv %s685_s8 }
   0x2   :  { %15 = vst [vmem:[#allocation2] sm:$0x1] %v14_v0 }
   0x3   :  { %16 = vsyncpa [#allocation4], 0 }
   0x4   :  { %17 = vsyncpa [#allocation7], 0 }
   0x5   :  { %18 = vsyncpa [#allocation5], 0  ;;  %s550_s11 = smov [#allocation3]   ;;  %s551_s13 = smov [#allocation6]  }
   0x6   :  { %s27_s12 = sshll.u32 %s550_s11, 4  ;;  %s42_s14 = sshll.u32 %s551_s13, 4  ;;  %s28_s12 = int_to_ptr.vmem [resolvable:$true] %s27_s12  ;;  %s612_s14 = int_to_ptr.vmem [resolvable:$true] %s42_s14 }
   0x7   :  { %s478_s17 = scalar_lea.hbm %s678_s1, 32 }
   0x8   :  { %p479_p0 = scmp.ne.s32.totalorder %s678_s1, %s478_s17  ;;  %p482_p1 = scmp.lt.u32.totalorder %s478_s17, %s678_s1 }
   0xa   :  { %p484_p2 = pnand %p482_p1, %p479_p0 }
   0xc   :  { %487 = shalt.err (!%p484_p2)
}
   0xd   :  { %s488_s21 = scalar_lea.vmem %s28_s12, 32  ;;  %p493_p4 = scmp.lt.s32.totalorder %s28_s12, %s28_s12 }
   0xe   :  { %p489_p3 = scmp.ne.s32.totalorder %s28_s12, %s488_s21  ;;  %p494_p5 = scmp.lt.s32.totalorder %s488_s21, %s488_s21 }
  0x10   :  { %p495_p6 = por %p494_p5, %p493_p4 }
  0x12   :  { %p496_p7 = pnand %p495_p6, %p489_p3 }
  0x14   :  { %499 = shalt.err (!%p496_p7)
}
  0x15   :  { %30 = dma.hbm_to_vmem [thread:$0]  %s678_s1, 32, %s28_s12, [#allocation4]  }
  0x16   :  { %s500_s26 = scalar_lea.hbm %s682_s5, 512 }
  0x17   :  { %p501_p8 = scmp.ne.s32.totalorder %s682_s5, %s500_s26  ;;  %p504_p9 = scmp.lt.u32.totalorder %s500_s26, %s682_s5 }
  0x19   :  { %p506_p10 = pnand %p504_p9, %p501_p8 }
  0x1b   :  { %509 = shalt.err (!%p506_p10)
}
  0x1c   :  { %s510_s10 = scalar_lea.vmem %s612_s14, 512  ;;  %p515_p12 = scmp.lt.s32.totalorder %s612_s14, %s612_s14 }
  0x1d   :  { %p511_p11 = scmp.ne.s32.totalorder %s612_s14, %s510_s10  ;;  %p516_p13 = scmp.lt.s32.totalorder %s510_s10, %s510_s10 }
  0x1f   :  { %p517_p0 = por %p516_p13, %p515_p12 }
  0x21   :  { %p518_p1 = pnand %p517_p0, %p511_p11 }
  0x23   :  { %521 = shalt.err (!%p518_p1)
}
  0x24   :  { %s552_s1 = smov 128   ;;  %s553_s11 = smov 8  }
  0x25   :  { %48 = dma.hbm_to_vmem [thread:$0]  %s682_s5, 512, %s612_s14, [#allocation7], %s552_s1, %s552_s1, %s553_s11  }
  0x26   :  { %544 = dma.done.wait [#allocation4], 32  }
  0x27   :  { %545 = vsyncadd [#allocation4], 4294967264 }
  0x28   :  { %546 = dma.done.wait [#allocation7], 512  }
  0x29   :  { %547 = vsyncadd [#allocation7], 4294966784  ;;  %v554_v1 = vmov 0.0   ;;  %vm555_vm0 = vmmov 0   ;;  %vm69_vm1 = vcmask 1043456   ;;  %vm65_vm2 = vcmask 31744  }
  0x2a   :  { %436 = vmatprep.subr.mxu0 %v554_v1  ;;  %441 = vmatprep.subr.mxu1 %v554_v1  ;;  %vm143_vm3 = vcmask 64512   ;;  %v64_v2 = vld [vmem:[%s680_s3] sm:$0xf]  ;;  %v556_v6 = vmov 0.0|0.0   ;;  %v227_v8 = vld [vmem:[#allocation6 + $0x8] sm:$0xff]  ;;  %v228_v10 = vld [vmem:[#allocation6 + $0x10] sm:$0xff]  ;;  %v319_v29 = vlaneseq }
  0x2b   :  { %438 = vmatprep.mubr.msk.f32.mxu0 %vm555_vm0, %v554_v1  ;;  %443 = vmatprep.mubr.msk.f32.mxu1 %vm555_vm0, %v554_v1  ;;  %v62_v3 = vld [vmem:[%s679_s2] sm:$0xff]  ;;  %vm237_vm4 = vcmask 261120   ;;  %v557_v22 = vmov 0   ;;  %s558_s20 = smov [#allocation8]   ;;  %vm399_vm5 = vcmask 8192  }
  0x2c   :  { %v63_v4 = vld [vmem:[#allocation3] sm:$0x3]  ;;  %437 = vmatpush3.msk.msra.mxu0 %vm69_vm1, %v64_v2  ;;  %442 = vmatpush3.msra.mxu1 %v62_v3  ;;  %v226_v7 = vld [vmem:[#allocation6] sm:$0xff]  ;;  %v420_v15 = vld [vmem:[%s681_s4] ss:$0 sm:$0xff]  ;;  %v320_v30 = vshrl.u32 %v319_v29, 7 }
  0x2d   :  { %v61_v5 = vld [vmem:[%s677_s0] sm:$0x3]  ;;  %439 = vmatmul.mubr.msk.f32.vlgmr.msra.gmra.mrb[0].mxu0 %vm65_vm2, %v63_v4  ;;  %462 = vmatprep.subr.bf16.mxu0 %v556_v6  ;;  %v463_v9 = vpack.c.bf16 %v227_v8, %v226_v7  ;;  %s407_s21 = sshll.u32 %s558_s20, 4  ;;  %s408_s21 = int_to_ptr.vmem [resolvable:$true] %s407_s21 }
  0x2e   :  { %444 = vmatmul.mubr.msk.f32.vlgmr.msra.gmra.mrb[0].mxu1 %vm143_vm3, %v61_v5  ;;  %454 = vmatprep.mubr.msk.f32.mxu0 %vm555_vm0, %v554_v1  ;;  %v229_v11 = vld [vmem:[#allocation6 + $0x18] sm:$0xff]  ;;  %v321_v31 = vsub.s32 0, %v320_v30  ;;  %s526_s22 = scalar_lea.vmem %s408_s21, 32  ;;  %p527_p3 = scmp.lt.s32.totalorder %s408_s21, %s408_s21 }
  0x2f   :  { %457 = vmatprep.subr.mxu1 %v554_v1  ;;  %459 = vmatprep.mubr.msk.f32.mxu1 %vm555_vm0, %v554_v1  ;;  %v466_v12 = vpack.c.bf16 %v229_v11, %v228_v10  ;;  %v313_v21 = vld [vmem:[#allocation2] sm:$0x1] }
  0x30   :  { %464 = vmatpush3.bf16.msra.mxu0 %v463_v9  ;;  %477 = vset.pattern.permute.xlu0 %v557_v22  ;;  %v421_v23 = vld [vmem:[%s683_s6] ss:$0 sm:$0xff]  ;;  %s522_s6 = scalar_lea.vmem %s408_s21, 16 }
  0x31   :  { %465 = vmatprep.subr.bf16.mxu0 %v556_v6  ;;  %316 = vperm.xlu0 %477, %v313_v21   ;;  %v312_v28 = vld [vmem:[%s684_s7] sm:$0x1]  ;;  %p523_p2 = scmp.ne.s32.totalorder %s408_s21, %s522_s6  ;;  %p528_p4 = scmp.lt.s32.totalorder %s526_s22, %s522_s6 }
  0x33   :  { %p529_p5 = por %p528_p4, %p527_p3 }
  0x34   :  { %467 = vmatpush3.bf16.msra.mxu0 %v466_v12 }
  0x35   :  { %p530_p6 = pnand %p529_p5, %p523_p2 }
  0xb0   :  { %v317_v32 = vpop.permute.xlu0 %316 }
  0xb1   :  { %v322_v33 = vrot.slane %v317_v32, %v321_v31 }
 0x100   :  { %v139_v13 = vpop.f32.mrb[0].mxu0 }
 0x101   :  { %v213_v14 = vpop.f32.mrb[0].mxu1  ;;  %v440_v17 = vpop.f32.mrb[1].mxu0 }
 0x102   :  { %v214_v16 = vadd.f32 %v213_v14, %v139_v13  ;;  %v445_v18 = vpop.f32.mrb[1].mxu1 }
 0x104   :  { %v224_v19 = vadd.f32 %v420_v15, %v214_v16 }
 0x106   :  { %v225_v20 = vmax.f32 %v224_v19, 0.0 }
 0x108   :  { %455 = vmatmul.mubr.msk.f32.vlgmr.msra.gmra.mrb[2].mxu0 %vm237_vm4, %v225_v20 }
 0x1db   :  { %v307_v24 = vpop.f32.mrb[2].mxu0 }
 0x1dc   :  { %v308_v25 = vadd.f32 %v421_v23, %v307_v24  ;;  %v456_v26 = vpop.f32.mrb[3].mxu0 }
 0x1de   :  { %v311_v27 = vmax.f32 %v308_v25, 0.0 }
 0x1e0   :  { %458 = vmatpush3.xpose.msk.msra.mxu1 %vm237_vm4, %v311_v27 }
 0x1e3   :  { %460 = vmatmul.mubr.msk.f32.vlgmr.msra.gmra.mrb[2].mxu1 %vm237_vm4, %v312_v28 }
 0x2b6   :  { %v395_v34 = vpop.f32.mrb[2].mxu1 }
 0x2b7   :  { %v396_v35 = vadd.f32 %v395_v34, %v322_v33  ;;  %v461_v36 = vpop.f32.mrb[3].mxu1 }
 0x2b9   :  { %400 = vst.msk [vmem:[#allocation8] sm:$0x1] %vm399_vm5, %v396_v35 }
 0x2ba   :  { %533 = shalt.err (!%p530_p6)
}
 0x2bb   :  { %s534_s24 = scalar_lea.hbm %s686_s9, 16 }
 0x2bc   :  { %p535_p7 = scmp.ne.s32.totalorder %s686_s9, %s534_s24  ;;  %p538_p8 = scmp.lt.u32.totalorder %s534_s24, %s686_s9 }
 0x2be   :  { %p540_p9 = pnand %p538_p8, %p535_p7 }
 0x2c0   :  { %543 = shalt.err (!%p540_p9)
}
 0x2c1   :  { %410 = dma.vmem_to_hbm [thread:$0]  %s408_s21, 16, %s686_s9, [#allocation5]  }
 0x2c2   :  { %548 = dma.done.wait [#allocation5], 16  }
 0x2c3   :  { %549 = vsyncadd [#allocation5], 4294967280 }
 0x2c4   :  { %414 = vsyncpa [#allocation4], 1 }
 0x2c5   :  { %415 = vsyncpa [#allocation7], 1 }
 0x2c6   :  { %416 = vsyncpa [#allocation5], 1 }

</bundles_post_ra>
